<compile_context>
chip_gen: v7x
topology: tpu7x:2x2x1
jax: 0.10.0
libtpu: 0.0.40
codegen_flags: <defaults>
</compile_context>

<pallas_src>
import math

import jax
import jax.numpy as jnp
from jax.experimental import pallas as pl
from jax.experimental.pallas import tpu as pltpu

_VMEM_LIMIT_BYTES = 32 * 1024 * 1024     # safe scoped-VMEM request on v5e/v6e/v7x
_TARGET_BLOCK_BYTES = 1 * 1024 * 1024    # per-operand block budget (double-buffered)


# ---------------------------------------------------------------------------
# Kernels (compute in f32, cast once on the way out)
# ---------------------------------------------------------------------------
def _alpha_blend_scalar_kernel(b_ref, left_ref, right_ref, out_ref):
    b = b_ref[0]                                    # f32 scalar from SMEM
    l = left_ref[...].astype(jnp.float32)
    r = right_ref[...].astype(jnp.float32)
    out_ref[...] = (r + b * (l - r)).astype(out_ref.dtype)


def _alpha_blend_tensor_kernel(left_ref, right_ref, blend_ref, out_ref):
    l = left_ref[...].astype(jnp.float32)
    r = right_ref[...].astype(jnp.float32)
    b = blend_ref[...].astype(jnp.float32)          # broadcasts over BCAST axis
    out_ref[...] = (r + b * (l - r)).astype(out_ref.dtype)


# ---------------------------------------------------------------------------
# Static tiling helpers (shapes are trace-time constants)
# ---------------------------------------------------------------------------
def _flat_2d_view(total, last_dim):
    """Lane-dense (rows, lanes) view of a flat element count, no padding."""
    dividing = [c for c in (1024, 512, 256, 128) if total % c == 0]
    if dividing:
        for lanes in dividing:                      # prefer >= 8 sublane rows
            if total // lanes >= 8:
                return total // lanes, lanes
        return total // dividing[0], dividing[0]
    if last_dim and total % last_dim == 0:          # non-128-multiple fallback
        return total // last_dim, last_dim
    return 1, total


def _pick_row_tile(rows, lanes, itemsize, target=_TARGET_BLOCK_BYTES):
    for cand in (2048, 1024, 512, 256, 128, 64, 32, 16, 8):
        if rows % cand == 0 and cand * lanes * itemsize <= target:
            return cand
    return rows                                     # full extent: always legal


def _pick_lane_tile(tail, bcast_rows, itemsize, target=_TARGET_BLOCK_BYTES):
    if tail % 128 != 0:
        return tail                                 # full extent: always legal
    tile = 128
    for cand in (256, 512, 1024, 2048):
        if tail % cand == 0 and cand * bcast_rows * itemsize <= target:
            tile = cand
    return tile


def _decompose_broadcast(l_shape, b_shape):
    """View left as (LEAD, BCAST, TAIL) with blend (LEAD, 1, TAIL); None if N/A."""
    nd = len(l_shape)
    i = nd
    while i > 0 and b_shape[i - 1] == l_shape[i - 1]:
        i -= 1
    j = i
    while j > 0 and b_shape[j - 1] == 1:
        j -= 1
    if any(b_shape[k] != l_shape[k] for k in range(j)):
        return None
    lead = math.prod(l_shape[:j]) if j > 0 else 1
    bcast = math.prod(l_shape[j:i]) if i > j else 1
    tail = math.prod(l_shape[i:]) if i < nd else 1
    return lead, bcast, tail


def _params(n_axes):
    return pltpu.CompilerParams(
        dimension_semantics=("parallel",) * n_axes,
        vmem_limit_bytes=_VMEM_LIMIT_BYTES,
    )


# ---------------------------------------------------------------------------
# pallas_call wrappers
# ---------------------------------------------------------------------------
@jax.jit
def _alpha_blend_scalar_call(left, right, b_arr):
    shape = left.shape
    out_dtype = jnp.result_type(left.dtype, right.dtype)
    total = math.prod(shape) if shape else 1
    last = shape[-1] if shape else 1
    rows, lanes = _flat_2d_view(total, last)
    row_tile = _pick_row_tile(rows, lanes, jnp.dtype(out_dtype).itemsize)
    tile_spec = pl.BlockSpec((row_tile, lanes), lambda i: (i, 0))
    out2 = pl.pallas_call(
        _alpha_blend_scalar_kernel,
        out_shape=jax.ShapeDtypeStruct((rows, lanes), out_dtype),
        grid=(rows // row_tile,),
        in_specs=[
            pl.BlockSpec(memory_space=pltpu.SMEM),   # blend scalar (f32)
            tile_spec,                               # left
            tile_spec,                               # right
        ],
        out_specs=tile_spec,
        compiler_params=_params(1),
    )(b_arr, left.reshape(rows, lanes), right.reshape(rows, lanes))
    return out2.reshape(shape)


def _tensor_same_shape_call(left, right, blend, out_dtype):
    shape = left.shape
    total = math.prod(shape) if shape else 1
    last = shape[-1] if shape else 1
    rows, lanes = _flat_2d_view(total, last)
    row_tile = _pick_row_tile(rows, lanes, jnp.dtype(out_dtype).itemsize)
    tile_spec = pl.BlockSpec((row_tile, lanes), lambda i: (i, 0))
    out2 = pl.pallas_call(
        _alpha_blend_tensor_kernel,
        out_shape=jax.ShapeDtypeStruct((rows, lanes), out_dtype),
        grid=(rows // row_tile,),
        in_specs=[tile_spec, tile_spec, tile_spec],
        out_specs=tile_spec,
        compiler_params=_params(1),
    )(left.reshape(rows, lanes), right.reshape(rows, lanes),
      blend.reshape(rows, lanes))
    return out2.reshape(shape)


def _tensor_bcast_call(left, right, blend, lead, bcast, tail, out_dtype):
    shape = left.shape
    lane_tile = _pick_lane_tile(tail, bcast, jnp.dtype(out_dtype).itemsize)
    data_spec = pl.BlockSpec((1, bcast, lane_tile), lambda n, t: (n, 0, t))
    blend_spec = pl.BlockSpec((1, 1, lane_tile), lambda n, t: (n, 0, t))
    out3 = pl.pallas_call(
        _alpha_blend_tensor_kernel,
        out_shape=jax.ShapeDtypeStruct((lead, bcast, tail), out_dtype),
        grid=(lead, tail // lane_tile),
        in_specs=[data_spec, data_spec, blend_spec],
        out_specs=data_spec,
        compiler_params=_params(2),
    )(left.reshape(lead, bcast, tail),
      right.reshape(lead, bcast, tail),
      blend.reshape(lead, 1, tail))
    return out3.reshape(shape)


@jax.jit
def _alpha_blend_tensor_call(left, right, blend):
    out_dtype = jnp.result_type(left.dtype, right.dtype, blend.dtype)
    out_shape = jnp.broadcast_shapes(left.shape, right.shape, blend.shape)
    if left.shape == out_shape and right.shape == out_shape:
        b_shape = (1,) * (len(out_shape) - blend.ndim) + tuple(blend.shape)
        if b_shape == tuple(out_shape):
            return _tensor_same_shape_call(
                left, right, blend.reshape(out_shape), out_dtype)
        dec = _decompose_broadcast(tuple(out_shape), b_shape)
        if dec is not None:
            lead, bcast, tail = dec
            return _tensor_bcast_call(
                left, right, blend, lead, bcast, tail, out_dtype)
    # TODO(synk): interleaved broadcast patterns (e.g. blend (N,1,H,1)) fall
    # back to a materialized broadcast before the same-shape kernel.
    l = jnp.broadcast_to(left, out_shape)
    r = jnp.broadcast_to(right, out_shape)
    b = jnp.broadcast_to(blend, out_shape)
    return _tensor_same_shape_call(l, r, b, out_dtype)


# ---------------------------------------------------------------------------
# Module wrapper
# ---------------------------------------------------------------------------
class AlphaBlend:
    """JAX/Pallas port of moai AlphaBlend: out = left*b + right*(1-b)."""

    def __init__(self, blend: float | None = None) -> None:
        self.blend = blend

    def __call__(self, left, right, blend=None):
        b = blend if blend is not None else self.blend
        if b is None:
            raise ValueError("blend factor must be provided")
        b_arr = jnp.asarray(b)
        if b_arr.ndim == 0:
            return _alpha_blend_scalar_call(
                left, right, b_arr.astype(jnp.float32).reshape((1,)))
        return _alpha_blend_tensor_call(left, right, b_arr)


# ---------------------------------------------------------------------------
# Demo / self-test
# ---------------------------------------------------------------------------
if __name__ == "__main__":
    key = jax.random.PRNGKey(0)
    k1, k2, k3 = jax.random.split(key, 3)

    N, C, H, W = 2, 4, 16, 16  # NCHW, matching the PyTorch convention
    left = jax.random.normal(k1, (N, C, H, W), dtype=jnp.float32)
    right = jax.random.normal(k2, (N, C, H, W), dtype=jnp.float32)

    mod = AlphaBlend(blend=0.3)

    # Case 1: scalar blend fixed at construction time (module __init__ arg).
    out_scalar = jax.block_until_ready(mod(left, right))
    ref_scalar = left * 0.3 + right * (1.0 - 0.3)
    assert jnp.allclose(out_scalar, ref_scalar, atol=1e-6), "scalar blend mismatch"

    # Case 2: runtime per-pixel alpha broadcast over channels (no HBM broadcast
    # materialization: blend stays (N,1,H,W), broadcast happens in-kernel).
    blend_t = jax.random.uniform(k3, (N, 1, H, W), dtype=jnp.float32)
    out_tensor = jax.block_until_ready(mod(left, right, blend=blend_t))
    ref_tensor = left * blend_t + right * (1.0 - blend_t)
    assert jnp.allclose(out_tensor, ref_tensor, atol=1e-6), "tensor blend mismatch"

    # Case 3: same-shape blend exercises the flat lane-dense tiled path.
    blend_full = jax.random.uniform(k3, (N, C, H, W), dtype=jnp.float32)
    out_full = jax.block_until_ready(mod(left, right, blend=blend_full))
    ref_full = left * blend_full + right * (1.0 - blend_full)
    assert jnp.allclose(out_full, ref_full, atol=1e-6), "same-shape blend mismatch"

    print("KERNEL_OK")
</pallas_src>

<mosaic_0001>
module attributes {stable_mosaic.version = 11 : i64} {
  func.func @_alpha_blend_scalar_kernel(%arg0: i32, %arg1: memref<1xf32, #tpu.memory_space<smem>>, %arg2: memref<8x256xf32, #tpu.memory_space<vmem>>, %arg3: memref<8x256xf32, #tpu.memory_space<vmem>>, %arg4: memref<8x256xf32, #tpu.memory_space<vmem>>) attributes {dimension_semantics = [#tpu.dimension_semantics<parallel>], iteration_bounds = array<i64: 1>, scalar_prefetch = 0 : i64, scratch_operands = 0 : i64, tpu.core_type = #tpu.core_type<tc>, window_params = [{transform_indices = @transform_0, window_bounds = array<i64: 1>}, {transform_indices = @transform_1, window_bounds = array<i64: 8, 256>}, {transform_indices = @transform_2, window_bounds = array<i64: 8, 256>}, {transform_indices = @transform_3, window_bounds = array<i64: 8, 256>}]} {
    %c0 = arith.constant 0 : index
    %0 = memref.load %arg1[%c0] : memref<1xf32, #tpu.memory_space<smem>>
    %c0_0 = arith.constant 0 : index
    %c0_1 = arith.constant 0 : index
    %1 = vector.load %arg2[%c0_0, %c0_1] : memref<8x256xf32, #tpu.memory_space<vmem>>, vector<8x256xf32>
    %c0_2 = arith.constant 0 : index
    %c0_3 = arith.constant 0 : index
    %2 = vector.load %arg3[%c0_2, %c0_3] : memref<8x256xf32, #tpu.memory_space<vmem>>, vector<8x256xf32>
    %3 = arith.subf %1, %2 : vector<8x256xf32>
    %4 = vector.broadcast %0 : f32 to vector<8x256xf32>
    %5 = arith.mulf %4, %3 : vector<8x256xf32>
    %6 = arith.addf %2, %5 : vector<8x256xf32>
    %c0_4 = arith.constant 0 : index
    %c0_5 = arith.constant 0 : index
    %7 = vector.load %arg4[%c0_4, %c0_5] : memref<8x256xf32, #tpu.memory_space<vmem>>, vector<8x256xf32>
    tpu.vector_store %arg4[%c0_4, %c0_5], %6 {strides = array<i32>} : memref<8x256xf32, #tpu.memory_space<vmem>>, vector<8x256xf32>,
    return
  }
  func.func @transform_0(%arg0: i32) -> i32 {
    %c0_i32 = arith.constant 0 : i32
    %c0_i32_0 = arith.constant 0 : i32
    return %c0_i32 : i32
  }
  func.func @transform_1(%arg0: i32) -> (i32, i32) {
    %c0_i32 = arith.constant 0 : i32
    %c0_i32_0 = arith.constant 0 : i32
    return %arg0, %c0_i32 : i32, i32
  }
  func.func @transform_2(%arg0: i32) -> (i32, i32) {
    %c0_i32 = arith.constant 0 : i32
    %c0_i32_0 = arith.constant 0 : i32
    return %arg0, %c0_i32 : i32, i32
  }
  func.func @transform_3(%arg0: i32) -> (i32, i32) {
    %c0_i32 = arith.constant 0 : i32
    %c0_i32_0 = arith.constant 0 : i32
    return %arg0, %c0_i32 : i32, i32
  }
}

</mosaic_0001>

<bundles_post_ra>
// kernel: _alpha_blend_scalar_call.1
= control target key start
LH: loop header
LB: loop body
LE: loop exit
PB: predicated region body
PF: predicated region fallthrough
CT: control target
= control target key end

     0   :  { %s74_s0 = inlined_call_operand.<no memory space> [shape: f32[1], index: 0, kind: input, shape index: {}]   ;;  %s75_s1 = inlined_call_operand.vmem [shape: f32[8,256], index: 1, kind: input, shape index: {}]   ;;  %s76_s2 = inlined_call_operand.vmem [shape: f32[8,256], index: 2, kind: input, shape index: {}]   ;;  %s77_s3 = inlined_call_operand.vmem [shape: f32[8,256], index: 3, kind: output, shape index: {}]  }
   0x1   :  { %v16_v0 = vld [vmem:[%s75_s1] sm:$0xff]  ;;  %v22_v2 = vstv %s74_s0  ;;  %v17_v3 = vld [vmem:[%s75_s1 + $0x8] sm:$0xff] }
   0x2   :  { %v18_v1 = vld [vmem:[%s76_s2] sm:$0xff]  ;;  %v19_v5 = vld [vmem:[%s76_s2 + $0x8] sm:$0xff] }
   0x3   :  { %v20_v4 = vsub.f32 %v16_v0, %v18_v1  ;;  %v21_v6 = vsub.f32 %v17_v3, %v19_v5 }
   0x5   :  { %v23_v7 = vmul.f32 %v22_v2, %v20_v4  ;;  %v24_v8 = vmul.f32 %v22_v2, %v21_v6 }
   0x7   :  { %v25_v9 = vadd.f32 %v23_v7, %v18_v1  ;;  %v26_v10 = vadd.f32 %v24_v8, %v19_v5 }
   0x9   :  { %27 = vst [vmem:[%s77_s3] sm:$0xff] %v25_v9  ;;  %28 = vst [vmem:[%s77_s3 + $0x8] sm:$0xff] %v26_v10 }

</bundles_post_ra>
